<compile_context>
chip_gen: v5e
topology: v5e:2x2
jax: 0.10.0
libtpu: 0.0.40
codegen_flags: <defaults>
</compile_context>

<pallas_src>
import jax
import jax.numpy as jnp
from jax import lax
from jax.experimental import pallas as pl
from jax.experimental.pallas import tpu as pltpu

EPS_BN = 1e-5
LEAKY_SLOPE = 0.2
_LANE = 128


def _round_up(x, m):
    return ((x + m - 1) // m) * m


def _cdiv(a, b):
    return -(-a // b)


def _vmem_budget_bytes():
    """VMEM we allow the kernels to use (with headroom below physical)."""
    phys = 64 * 1024 * 1024  # conservative v7x default if the query fails
    try:
        phys = int(pltpu.get_tpu_info().vmem_capacity_bytes)
    except Exception:
        pass
    return max(32 * 1024 * 1024,
               min(phys - 16 * 1024 * 1024, 100 * 1024 * 1024))


def _pick_pass1_tm(tk, c_pad, budget):
    """Largest M tile whose pass-1 per-step footprint fits the VMEM budget."""
    tm = 2048
    while tm > 128:
        fp = (2 * tm * tk * 2        # patch tile (bf16), double-buffered
              + 2 * tk * c_pad * 2   # weight tile (bf16), double-buffered
              + 2 * tm * c_pad * 2   # bf16 y tile out, double-buffered
              + tm * c_pad * 4       # f32 accumulator scratch
              + 4 * 2 * c_pad * 4)   # stats tiles (generous)
        if fp <= int(budget * 0.85):
            break
        tm //= 2
    return tm


# --------------------------- Pallas kernels ---------------------------------

def _matmul_stats_kernel(p_ref, w_ref, y_ref, stats_ref, acc_ref):
    """Conv-as-matmul on the MXU, K-tiled, with per-tile partial BN stats."""
    k = pl.program_id(1)

    @pl.when(k == 0)
    def _():
        acc_ref[...] = jnp.zeros_like(acc_ref)

    # bf16 x bf16 operands, f32 accumulation.
    acc_ref[...] += jnp.dot(p_ref[...], w_ref[...],
                            preferred_element_type=jnp.float32)

    @pl.when(k == pl.num_programs(1) - 1)
    def _():
        y = acc_ref[...]
        # Partial BatchNorm stats from the f32 accumulator (before the bf16
        # cast): row 0 = sum, row 1 = sum of squares.
        ssum = jnp.sum(y, axis=0, keepdims=True)       # (1, C_pad)
        ssq = jnp.sum(y * y, axis=0, keepdims=True)    # (1, C_pad)
        stats_ref[...] = jnp.concatenate([ssum, ssq], axis=0)[None, :, :]
        # bf16 intermediate activation -> half the HBM write + half the pass-2
        # read vs the previous f32 version.
        y_ref[...] = y.astype(y_ref.dtype)


def _bn_lrelu_kernel(y_ref, a_ref, b_ref, o_ref):
    """Fused BN affine (one FMA per element) + LeakyReLU(0.2)."""
    z = y_ref[...].astype(jnp.float32) * a_ref[...] + b_ref[...]
    o_ref[...] = jnp.where(z >= 0, z, LEAKY_SLOPE * z).astype(o_ref.dtype)


# --------------------------- wrapper -----------------------------------------

def _spectral_norm_weight(w_flat, u, n_power_iterations=1, eps=1e-12):
    # Mirrors torch.nn.utils.spectral_norm forward (one power iteration, W/sigma).
    # TODO(synk): the updated `u` is not returned, so the persistent power-
    # iteration state across training steps is not replicated (a single forward
    # pass is identical).
    v = None
    for _ in range(n_power_iterations):
        v = w_flat.T @ u
        v = v / (jnp.linalg.norm(v) + eps)
        u = w_flat @ v
        u = u / (jnp.linalg.norm(u) + eps)
    sigma = u @ (w_flat @ v)
    return w_flat / sigma


def downblock_forward(x_nchw, weight, bias, gamma, beta, u,
                      out_dtype=jnp.float32):
    # Conv bias is exactly cancelled by training-mode BatchNorm mean
    # subtraction, so it never enters the kernel (one less DMA + VPU add).
    del bias

    N, Cin, H, W = x_nchw.shape
    Cout = weight.shape[0]
    kh = kw = 4
    stride, pad = 2, 1
    OH = (H + 2 * pad - kh) // stride + 1
    OW = (W + 2 * pad - kw) // stride + 1
    K = Cin * kh * kw
    M = N * OH * OW

    # spectral-normalized flattened conv weight (Cout, K)
    w_sn = _spectral_norm_weight(weight.reshape(Cout, K), u)

    # im2col patches (feature order (c, kh, kw) matches torch weight.reshape).
    # TODO(synk): move this into the kernel via haloed input bands + manual DMA
    # to kill the 4x-expanded HBM copy (largest remaining structural cost).
    patches = lax.conv_general_dilated_patches(
        x_nchw, filter_shape=(kh, kw), window_strides=(stride, stride),
        padding=((pad, pad), (pad, pad)))
    patches = jnp.transpose(patches, (0, 2, 3, 1)).reshape(M, K)

    # ----- TPU-friendly padded shapes & tile sizes -----
    budget = _vmem_budget_bytes()
    C_pad = _round_up(Cout, _LANE)             # lane-dense output channels
    K_pad0 = _round_up(K, _LANE)
    TK = min(K_pad0, 1024)                     # contraction tile (K grid axis)
    K_pad = _round_up(K, TK)
    num_k = K_pad // TK

    TM1 = _pick_pass1_tm(TK, C_pad, budget)    # pass-1 M tile
    TM1 = min(TM1, _round_up(M, 8))

    # pass-2 tile: pure streaming pass, so make it a few times larger.
    out_bytes = jnp.dtype(out_dtype).itemsize
    f = 4
    while f > 1:
        fp2 = 2 * (f * TM1) * C_pad * 2 + 2 * (f * TM1) * C_pad * out_bytes
        if fp2 <= int(budget * 0.85):
            break
        f //= 2
    f = max(1, min(f, _cdiv(M, TM1)))
    TM2 = f * TM1

    M_pad = _round_up(M, TM2)                  # multiple of both TM1 and TM2
    num_m1 = M_pad // TM1
    num_m2 = M_pad // TM2

    # bf16 MXU operands; f32 accumulation inside the kernel. Padded rows are
    # exactly zero so BN stat division by the true M stays exact.
    patches_p = jnp.pad(patches.astype(jnp.bfloat16),
                        ((0, M_pad - M), (0, K_pad - K)))
    w_p = jnp.pad(w_sn.T.astype(jnp.bfloat16),
                  ((0, K_pad - K), (0, C_pad - Cout)))
    gamma_p = jnp.pad(gamma.astype(jnp.float32), (0, C_pad - Cout))
    beta_p = jnp.pad(beta.astype(jnp.float32), (0, C_pad - Cout))

    # ---- pass 1: K-tiled conv matmul + per-tile partial BN statistics ----
    y_flat, stats = pl.pallas_call(
        _matmul_stats_kernel,
        out_shape=(jax.ShapeDtypeStruct((M_pad, C_pad), jnp.bfloat16),
                   jax.ShapeDtypeStruct((num_m1, 2, C_pad), jnp.float32)),
        grid=(num_m1, num_k),
        in_specs=[pl.BlockSpec((TM1, TK), lambda i, k: (i, k)),
                  pl.BlockSpec((TK, C_pad), lambda i, k: (k, 0))],
        out_specs=(pl.BlockSpec((TM1, C_pad), lambda i, k: (i, 0)),
                   pl.BlockSpec((1, 2, C_pad), lambda i, k: (i, 0, 0))),
        scratch_shapes=[pltpu.VMEM((TM1, C_pad), jnp.float32)],
        compiler_params=pltpu.CompilerParams(
            dimension_semantics=("parallel", "arbitrary"),
            vmem_limit_bytes=budget),
    )(patches_p, w_p)

    # ---- tiny cross-tile reduction + fold BN into one scale/shift ----
    ssum = jnp.sum(stats[:, 0, :], axis=0)
    ssq = jnp.sum(stats[:, 1, :], axis=0)
    mean = ssum / M
    var = jnp.maximum(ssq / M - mean * mean, 0.0)
    a = gamma_p * lax.rsqrt(var + EPS_BN)      # padded channels -> 0 (gamma_p = 0)
    b = beta_p - mean * a
    a_row = a.reshape(1, C_pad)
    b_row = b.reshape(1, C_pad)

    # ---- pass 2: fused BN affine + LeakyReLU, larger streaming tiles ----
    out_flat = pl.pallas_call(
        _bn_lrelu_kernel,
        out_shape=jax.ShapeDtypeStruct((M_pad, C_pad), out_dtype),
        grid=(num_m2,),
        in_specs=[pl.BlockSpec((TM2, C_pad), lambda i: (i, 0)),
                  pl.BlockSpec((1, C_pad), lambda i: (0, 0)),
                  pl.BlockSpec((1, C_pad), lambda i: (0, 0))],
        out_specs=pl.BlockSpec((TM2, C_pad), lambda i: (i, 0)),
        compiler_params=pltpu.CompilerParams(
            dimension_semantics=("parallel",),
            vmem_limit_bytes=budget),
    )(y_flat, a_row, b_row)

    out = out_flat[:M, :Cout].reshape(N, OH, OW, Cout)
    # Keep the PyTorch NCHW contract; drop this transpose (and pass
    # out_dtype=bf16) when chaining into an NHWC consumer.
    return jnp.transpose(out, (0, 3, 1, 2))


# --------------------------- reference & demo --------------------------------

def _reference_forward(x, weight, bias, gamma, beta, u):
    Cout = weight.shape[0]
    w_sn = _spectral_norm_weight(weight.reshape(Cout, -1), u).reshape(weight.shape)
    y = lax.conv_general_dilated(
        x, w_sn, window_strides=(2, 2), padding=((1, 1), (1, 1)),
        dimension_numbers=("NCHW", "OIHW", "NCHW"))
    y = y + bias.reshape(1, Cout, 1, 1)
    mean = jnp.mean(y, axis=(0, 2, 3), keepdims=True)
    var = jnp.var(y, axis=(0, 2, 3), keepdims=True)
    yhat = (y - mean) * lax.rsqrt(var + EPS_BN)
    yhat = yhat * gamma.reshape(1, Cout, 1, 1) + beta.reshape(1, Cout, 1, 1)
    return jnp.where(yhat >= 0, yhat, LEAKY_SLOPE * yhat)


if __name__ == "__main__":
    key = jax.random.PRNGKey(0)
    N, Cin, H, W = 2, 4, 16, 16
    Cout = 8

    k_w, k_b, k_u, k_x = jax.random.split(key, 4)
    weight = jax.random.normal(k_w, (Cout, Cin, 4, 4), jnp.float32) * 0.1
    bias = jax.random.normal(k_b, (Cout,), jnp.float32) * 0.1
    gamma = jnp.ones((Cout,), jnp.float32)   # BatchNorm2d weight init
    beta = jnp.zeros((Cout,), jnp.float32)   # BatchNorm2d bias init
    u = jax.random.normal(k_u, (Cout,), jnp.float32)
    u = u / (jnp.linalg.norm(u) + 1e-12)     # spectral-norm power-iter vector

    x = jax.random.normal(k_x, (N, Cin, H, W), jnp.float32)

    out = downblock_forward(x, weight, bias, gamma, beta, u)
    jax.block_until_ready(out)
    assert out.shape == (N, Cout, H // 2, W // 2)

    # Numerical check vs the plain-XLA path: validates im2col feature ordering,
    # bias/BN cancellation, bf16 intermediate activation and the K-tiled
    # accumulation. Loose tolerance accounts for bf16 MXU operands.
    ref = _reference_forward(x, weight, bias, gamma, beta, u)
    max_err = float(jnp.max(jnp.abs(out - ref)))
    assert max_err < 0.15, f"max abs err {max_err}"

    print("KERNEL_OK")
</pallas_src>

<mosaic_0001>
module attributes {stable_mosaic.version = 11 : i64} {
  func.func @_matmul_stats_kernel(%arg0: i32, %arg1: i32, %arg2: memref<128x128xbf16, #tpu.memory_space<vmem>>, %arg3: memref<128x128xbf16, #tpu.memory_space<vmem>>, %arg4: memref<128x128xbf16, #tpu.memory_space<vmem>>, %arg5: memref<1x2x128xf32, #tpu.memory_space<vmem>>, %arg6: memref<128x128xf32, #tpu.memory_space<vmem>>) attributes {dimension_semantics = [#tpu.dimension_semantics<parallel>, #tpu.dimension_semantics<arbitrary>], iteration_bounds = array<i64: 1, 1>, scalar_prefetch = 0 : i64, scratch_operands = 1 : i64, tpu.core_type = #tpu.core_type<tc>, window_params = [{transform_indices = @transform_0, window_bounds = array<i64: 128, 128>}, {transform_indices = @transform_1, window_bounds = array<i64: 128, 128>}, {transform_indices = @transform_2, window_bounds = array<i64: 128, 128>}, {transform_indices = @transform_3, window_bounds = array<i64: 1, 2, 128>}]} {
    %c0_i32 = arith.constant 0 : i32
    %0 = arith.cmpi eq, %arg1, %c0_i32 : i32
    %1 = arith.extui %0 : i1 to i32
    %c0_i32_0 = arith.constant 0 : i32
    %2 = arith.cmpi ne, %1, %c0_i32_0 : i32
    scf.if %2 {
      %cst_10 = arith.constant 0.000000e+00 : f32
      %12 = vector.broadcast %cst_10 : f32 to vector<128x128xf32>
      %c0_11 = arith.constant 0 : index
      %c0_12 = arith.constant 0 : index
      %13 = vector.load %arg6[%c0_11, %c0_12] : memref<128x128xf32, #tpu.memory_space<vmem>>, vector<128x128xf32>
      tpu.vector_store %arg6[%c0_11, %c0_12], %12 {strides = array<i32>} : memref<128x128xf32, #tpu.memory_space<vmem>>, vector<128x128xf32>,
    } else {
    }
    %c0 = arith.constant 0 : index
    %c0_1 = arith.constant 0 : index
    %3 = vector.load %arg6[%c0, %c0_1] : memref<128x128xf32, #tpu.memory_space<vmem>>, vector<128x128xf32>
    %c0_2 = arith.constant 0 : index
    %c0_3 = arith.constant 0 : index
    %4 = vector.load %arg2[%c0_2, %c0_3] : memref<128x128xbf16, #tpu.memory_space<vmem>>, vector<128x128xbf16>
    %c0_4 = arith.constant 0 : index
    %c0_5 = arith.constant 0 : index
    %5 = vector.load %arg3[%c0_4, %c0_5] : memref<128x128xbf16, #tpu.memory_space<vmem>>, vector<128x128xbf16>
    %cst = arith.constant dense<0.000000e+00> : vector<128x128xf32>
    %6 = tpu.matmul %4, %5, %cst {dimension_numbers = #tpu.dot_dimension_numbers<[1], [0], [0], [1], [0, 0, 1, 1], [], []>} : vector<128x128xbf16>, vector<128x128xbf16>, vector<128x128xf32> -> vector<128x128xf32>
    %7 = arith.addf %3, %6 : vector<128x128xf32>
    %c0_6 = arith.constant 0 : index
    %c0_7 = arith.constant 0 : index
    %8 = vector.load %arg6[%c0_6, %c0_7] : memref<128x128xf32, #tpu.memory_space<vmem>>, vector<128x128xf32>
    tpu.vector_store %arg6[%c0_6, %c0_7], %7 {strides = array<i32>} : memref<128x128xf32, #tpu.memory_space<vmem>>, vector<128x128xf32>,
    %c0_i32_8 = arith.constant 0 : i32
    %9 = arith.cmpi eq, %arg1, %c0_i32_8 : i32
    %10 = arith.extui %9 : i1 to i32
    %c0_i32_9 = arith.constant 0 : i32
    %11 = arith.cmpi ne, %10, %c0_i32_9 : i32
    scf.if %11 {
      %c0_10 = arith.constant 0 : index
      %c0_11 = arith.constant 0 : index
      %12 = vector.load %arg6[%c0_10, %c0_11] : memref<128x128xf32, #tpu.memory_space<vmem>>, vector<128x128xf32>
      %cst_12 = arith.constant dense<0.000000e+00> : vector<128xf32>
      %13 = vector.multi_reduction <add>, %12, %cst_12 [0] : vector<128x128xf32> to vector<128xf32>
      %14 = vector.shape_cast %13 : vector<128xf32> to vector<1x128xf32>
      %15 = arith.mulf %12, %12 : vector<128x128xf32>
      %cst_13 = arith.constant dense<0.000000e+00> : vector<128xf32>
      %16 = vector.multi_reduction <add>, %15, %cst_13 [0] : vector<128x128xf32> to vector<128xf32>
      %17 = vector.shape_cast %16 : vector<128xf32> to vector<1x128xf32>
      %18 = tpu.concatenate %14, %17 in 0 : vector<1x128xf32>, vector<1x128xf32> -> vector<2x128xf32>
      %19 = vector.shape_cast %18 : vector<2x128xf32> to vector<1x2x128xf32>
      %c0_14 = arith.constant 0 : index
      %c0_15 = arith.constant 0 : index
      %c0_16 = arith.constant 0 : index
      %20 = vector.load %arg5[%c0_14, %c0_15, %c0_16] : memref<1x2x128xf32, #tpu.memory_space<vmem>>, vector<1x2x128xf32>
      tpu.vector_store %arg5[%c0_14, %c0_15, %c0_16], %19 {strides = array<i32>} : memref<1x2x128xf32, #tpu.memory_space<vmem>>, vector<1x2x128xf32>,
      %21 = arith.truncf %12 : vector<128x128xf32> to vector<128x128xbf16>
      %c0_17 = arith.constant 0 : index
      %c0_18 = arith.constant 0 : index
      %22 = vector.load %arg4[%c0_17, %c0_18] : memref<128x128xbf16, #tpu.memory_space<vmem>>, vector<128x128xbf16>
      tpu.vector_store %arg4[%c0_17, %c0_18], %21 {strides = array<i32>} : memref<128x128xbf16, #tpu.memory_space<vmem>>, vector<128x128xbf16>,
    } else {
    }
    return
  }
  func.func @transform_0(%arg0: i32, %arg1: i32) -> (i32, i32) {
    %c0_i32 = arith.constant 0 : i32
    return %arg0, %arg1 : i32, i32
  }
  func.func @transform_1(%arg0: i32, %arg1: i32) -> (i32, i32) {
    %c0_i32 = arith.constant 0 : i32
    %c0_i32_0 = arith.constant 0 : i32
    return %arg1, %c0_i32 : i32, i32
  }
  func.func @transform_2(%arg0: i32, %arg1: i32) -> (i32, i32) {
    %c0_i32 = arith.constant 0 : i32
    %c0_i32_0 = arith.constant 0 : i32
    return %arg0, %c0_i32 : i32, i32
  }
  func.func @transform_3(%arg0: i32, %arg1: i32) -> (i32, i32, i32) {
    %c0_i32 = arith.constant 0 : i32
    %c0_i32_0 = arith.constant 0 : i32
    %c0_i32_1 = arith.constant 0 : i32
    return %arg0, %c0_i32, %c0_i32_0 : i32, i32, i32
  }
}

</mosaic_0001>

<bundles_post_ra>
// kernel: tpu_custom_call.1
= control target key start
LH: loop header
LB: loop body
LE: loop exit
PB: predicated region body
PF: predicated region fallthrough
CT: control target
= control target key end

     0   :  { %9 = vsyncpa [#allocation4], 0  ;;  %s760_s0 = inlined_call_operand.hbm [shape: bf16[128,128], index: 0, kind: input, shape index: {}]   ;;  %s761_s1 = inlined_call_operand.hbm [shape: bf16[128,128], index: 1, kind: input, shape index: {}]   ;;  %s762_s2 = inlined_call_operand.hbm [shape: bf16[128,128], index: 2, kind: output, shape index: {0}]   ;;  %s763_s3 = inlined_call_operand.hbm [shape: f32[1,2,128], index: 3, kind: output, shape index: {1}]  }
   0x1   :  { %10 = vsyncpa [#allocation7], 0 }
   0x2   :  { %11 = vsyncpa [#allocation5], 0 }
   0x3   :  { %12 = vsyncpa [#allocation10], 0  ;;  %s17_s14 = sshll.u32 %s760_s0, 4  ;;  %s701_s15 = smov [#allocation3]   ;;  %s18_s14 = int_to_ptr.hbm [resolvable:$true] %s17_s14 }
   0x4   :  { %s19_s16 = sshll.u32 %s701_s15, 4  ;;  %s30_s19 = sshll.u32 %s761_s1, 4  ;;  %s20_s16 = int_to_ptr.vmem [resolvable:$true] %s19_s16  ;;  %s31_s19 = int_to_ptr.hbm [resolvable:$true] %s30_s19 }
   0x5   :  { %s702_s20 = smov 64   ;;  %s703_s21 = smov 4  }
   0x6   :  { %25 = dma.hbm_to_vmem [thread:$0]  %s18_s14, 1024, %s20_s16, [#allocation4], %s702_s20, %s702_s20, %s703_s21  }
   0x7   :  { %s704_s22 = smov [#allocation6]  }
   0x8   :  { %s32_s23 = sshll.u32 %s704_s22, 4  ;;  %s33_s23 = int_to_ptr.vmem [resolvable:$true] %s32_s23 }
   0x9   :  { %38 = dma.hbm_to_vmem [thread:$0]  %s31_s19, 1024, %s33_s23, [#allocation7], %s702_s20, %s702_s20, %s703_s21  }
   0xa   :  { %693 = dma.done.wait [#allocation4], 1024  }
   0xb   :  { %694 = vsyncadd [#allocation4], 4294966272 }
   0xc   :  { %695 = dma.done.wait [#allocation7], 1024  }
   0xd   :  { %696 = vsyncadd [#allocation7], 4294966272  ;;  %v519_v0 = vld [vmem:[#allocation6 + $0x38] sm:$0xff]  ;;  %v518_v1 = vld [vmem:[#allocation6 + $0x30] sm:$0xff]  ;;  %s705_s0 = smov [#allocation8]   ;;  %s410_s26 = sshll.u32 %s762_s2, 4  ;;  %s411_s26 = int_to_ptr.hbm [resolvable:$true] %s410_s26 }
   0xe   :  { %211 = vmatpush.bf16.msra.mxu0 %v519_v0  ;;  %567 = vmatpush.bf16.msra.mxu1 %v519_v0  ;;  %v517_v2 = vld [vmem:[#allocation6 + $0x28] sm:$0xff]  ;;  %v516_v3 = vld [vmem:[#allocation6 + $0x20] sm:$0xff]  ;;  %v515_v4 = vld [vmem:[#allocation6 + $0x18] sm:$0xff]  ;;  %s408_s1 = sshll.u32 %s705_s0, 4  ;;  %s706_s2 = smov [#allocation9]   ;;  %vm369_vm0 = vcmask 1040384   ;;  %s409_s1 = int_to_ptr.vmem [resolvable:$true] %s408_s1 }
   0xf   :  { %568 = vmatpush.bf16.msra.mxu2 %v519_v0  ;;  %569 = vmatpush.bf16.msra.mxu3 %v519_v0  ;;  %v514_v5 = vld [vmem:[#allocation6 + $0x10] sm:$0xff]  ;;  %v513_v6 = vld [vmem:[#allocation6 + $0x8] sm:$0xff]  ;;  %v512_v7 = vld [vmem:[#allocation6] sm:$0xff]  ;;  %s422_s27 = sshll.u32 %s706_s2, 4  ;;  %s424_s30 = sshll.u32 %s763_s3, 4  ;;  %s423_s27 = int_to_ptr.vmem [resolvable:$true] %s422_s27  ;;  %s425_s30 = int_to_ptr.hbm [resolvable:$true] %s424_s30 }
  0x10   :  { %v504_v8 = vld [vmem:[#allocation3] sm:$0xff]  ;;  %v506_v9 = vld [vmem:[#allocation3 + $0x10] sm:$0xff]  ;;  %v505_v12 = vld [vmem:[#allocation3 + $0x8] sm:$0xff] }
  0x11   :  { %v508_v10 = vld [vmem:[#allocation3 + $0x20] sm:$0xff]  ;;  %v510_v11 = vld [vmem:[#allocation3 + $0x30] sm:$0xff]  ;;  %v507_v13 = vld [vmem:[#allocation3 + $0x18] sm:$0xff] }
  0x12   :  { %212 = vmatpush.bf16.msra.mxu0 %v518_v1  ;;  %570 = vmatpush.bf16.msra.mxu1 %v518_v1  ;;  %v509_v14 = vld [vmem:[#allocation3 + $0x28] sm:$0xff]  ;;  %v511_v15 = vld [vmem:[#allocation3 + $0x38] sm:$0xff] }
  0x13   :  { %571 = vmatpush.bf16.msra.mxu2 %v518_v1  ;;  %572 = vmatpush.bf16.msra.mxu3 %v518_v1 }
  0x16   :  { %213 = vmatpush.bf16.msra.mxu0 %v517_v2  ;;  %573 = vmatpush.bf16.msra.mxu1 %v517_v2 }
  0x17   :  { %574 = vmatpush.bf16.msra.mxu2 %v517_v2  ;;  %575 = vmatpush.bf16.msra.mxu3 %v517_v2 }
  0x1a   :  { %214 = vmatpush.bf16.msra.mxu0 %v516_v3  ;;  %576 = vmatpush.bf16.msra.mxu1 %v516_v3 }
  0x1b   :  { %577 = vmatpush.bf16.msra.mxu2 %v516_v3  ;;  %578 = vmatpush.bf16.msra.mxu3 %v516_v3 }
  0x1e   :  { %215 = vmatpush.bf16.msra.mxu0 %v515_v4  ;;  %579 = vmatpush.bf16.msra.mxu1 %v515_v4 }
  0x1f   :  { %580 = vmatpush.bf16.msra.mxu2 %v515_v4  ;;  %581 = vmatpush.bf16.msra.mxu3 %v515_v4 }
  0x22   :  { %216 = vmatpush.bf16.msra.mxu0 %v514_v5  ;;  %582 = vmatpush.bf16.msra.mxu1 %v514_v5 }
  0x23   :  { %583 = vmatpush.bf16.msra.mxu2 %v514_v5  ;;  %584 = vmatpush.bf16.msra.mxu3 %v514_v5 }
  0x26   :  { %217 = vmatpush.bf16.msra.mxu0 %v513_v6  ;;  %585 = vmatpush.bf16.msra.mxu1 %v513_v6 }
  0x27   :  { %586 = vmatpush.bf16.msra.mxu2 %v513_v6  ;;  %587 = vmatpush.bf16.msra.mxu3 %v513_v6 }
  0x2a   :  { %218 = vmatpush.bf16.msra.mxu0 %v512_v7  ;;  %588 = vmatpush.bf16.msra.mxu1 %v512_v7 }
  0x2b   :  { %589 = vmatpush.bf16.msra.mxu2 %v512_v7  ;;  %590 = vmatpush.bf16.msra.mxu3 %v512_v7 }
  0x2d   :  { %219 = vmatmul.bf16.vlgmr.msra.gmra.mxu0 %v504_v8  ;;  %229 = vmatmul.bf16.vlgmr.msra.gmra.mxu1 %v506_v9 }
  0x2e   :  { %239 = vmatmul.bf16.vlgmr.msra.gmra.mxu2 %v508_v10  ;;  %249 = vmatmul.bf16.vlgmr.msra.gmra.mxu3 %v510_v11 }
  0x3d   :  { %224 = vmatmul.bf16.gmra.mxu0 %v505_v12  ;;  %234 = vmatmul.bf16.gmra.mxu1 %v507_v13 }
  0x3e   :  { %244 = vmatmul.bf16.gmra.mxu2 %v509_v14  ;;  %254 = vmatmul.bf16.gmra.mxu3 %v511_v15 }
  0xaa   :  { %v220_v16 = vpop.f32.mrf.mxu0  ;;  %v230_v17 = vpop.f32.mrf.mxu1 }
  0xab   :  { %v332_v31 = vmul.f32 %v220_v16, %v220_v16  ;;  %v336_v45 = vmul.f32 %v230_v17, %v230_v17 }
  0xb1   :  { %v240_v18 = vpop.f32.mrf.mxu2  ;;  %v739_v19 = vpop.f32.mrf.mxu3 }
  0xb2   :  { %v222_v20 = vpop.f32.mrf.mxu0  ;;  %v232_v21 = vpop.f32.mrf.mxu1  ;;  %v340_v61 = vmul.f32 %v240_v18, %v240_v18  ;;  %v344_v9 = vmul.f32 %v739_v19, %v739_v19 }
  0xb3   :  { %v523_v22 = vpack.c.bf16 %v222_v20, %v220_v16  ;;  %v533_v23 = vpack.c.bf16 %v232_v21, %v230_v17  ;;  %v333_v30 = vmul.f32 %v222_v20, %v222_v20  ;;  %v311_v32 = vadd.f32 %v222_v20, %v220_v16 }
  0xb4   :  { %v337_v48 = vmul.f32 %v232_v21, %v232_v21 }
  0xb5   :  { %524 = vst [vmem:[#allocation8] sm:$0xff] %v523_v22   ;;  %v348_v34 = vadd.f32 %v333_v30, %v332_v31 }
  0xb6   :  { %561 = vst [vmem:[#allocation8 + $0x10] sm:$0xff] %v533_v23  }
  0xb9   :  { %v242_v24 = vpop.f32.mrf.mxu2  ;;  %v741_v25 = vpop.f32.mrf.mxu3 }
  0xba   :  { %v225_v26 = vpop.f32.mrf.mxu0  ;;  %v235_v27 = vpop.f32.mrf.mxu1  ;;  %v543_v28 = vpack.c.bf16 %v242_v24, %v240_v18  ;;  %v553_v29 = vpack.c.bf16 %v741_v25, %v739_v19  ;;  %v341_v0 = vmul.f32 %v242_v24, %v242_v24  ;;  %v345_v12 = vmul.f32 %v741_v25, %v741_v25 }
  0xbb   :  { %v334_v33 = vmul.f32 %v225_v26, %v225_v26  ;;  %v312_v35 = vadd.f32 %v311_v32, %v225_v26  ;;  %v338_v51 = vmul.f32 %v235_v27, %v235_v27 }
  0xbc   :  { %563 = vst [vmem:[#allocation8 + $0x20] sm:$0xff] %v543_v28  }
  0xbd   :  { %565 = vst [vmem:[#allocation8 + $0x30] sm:$0xff] %v553_v29   ;;  %v349_v40 = vadd.f32 %v348_v34, %v334_v33 }
  0xc1   :  { %v245_v36 = vpop.f32.mrf.mxu2  ;;  %v255_v37 = vpop.f32.mrf.mxu3 }
  0xc2   :  { %v227_v38 = vpop.f32.mrf.mxu0  ;;  %v237_v39 = vpop.f32.mrf.mxu1  ;;  %v342_v4 = vmul.f32 %v245_v36, %v245_v36  ;;  %v346_v16 = vmul.f32 %v255_v37, %v255_v37 }
  0xc3   :  { %v313_v41 = vadd.f32 %v312_v35, %v227_v38  ;;  %v335_v42 = vmul.f32 %v227_v38, %v227_v38  ;;  %v528_v43 = vpack.c.bf16 %v227_v38, %v225_v26  ;;  %v538_v44 = vpack.c.bf16 %v237_v39, %v235_v27 }
  0xc4   :  { %v339_v59 = vmul.f32 %v237_v39, %v237_v39 }
  0xc5   :  { %v314_v46 = vadd.f32 %v313_v41, %v230_v17  ;;  %v350_v47 = vadd.f32 %v349_v40, %v335_v42  ;;  %560 = vst [vmem:[#allocation8 + $0x8] sm:$0xff] %v528_v43  }
  0xc6   :  { %562 = vst [vmem:[#allocation8 + $0x18] sm:$0xff] %v538_v44  }
  0xc7   :  { %v351_v49 = vadd.f32 %v350_v47, %v336_v45  ;;  %v315_v50 = vadd.f32 %v314_v46, %v232_v21 }
  0xc9   :  { %v316_v52 = vadd.f32 %v315_v50, %v235_v27  ;;  %v352_v53 = vadd.f32 %v351_v49, %v337_v48  ;;  %v247_v54 = vpop.f32.mrf.mxu2  ;;  %v257_v55 = vpop.f32.mrf.mxu3 }
  0xca   :  { %v548_v56 = vpack.c.bf16 %v247_v54, %v245_v36  ;;  %v558_v57 = vpack.c.bf16 %v257_v55, %v255_v37  ;;  %v343_v8 = vmul.f32 %v247_v54, %v247_v54  ;;  %v347_v21 = vmul.f32 %v257_v55, %v257_v55 }
  0xcb   :  { %v317_v58 = vadd.f32 %v316_v52, %v237_v39  ;;  %v353_v60 = vadd.f32 %v352_v53, %v338_v51 }
  0xcc   :  { %564 = vst [vmem:[#allocation8 + $0x28] sm:$0xff] %v548_v56  }
  0xcd   :  { %v318_v62 = vadd.f32 %v317_v58, %v240_v18  ;;  %v354_v63 = vadd.f32 %v353_v60, %v339_v59  ;;  %566 = vst [vmem:[#allocation8 + $0x38] sm:$0xff] %v558_v57  }
  0xce   :  { %416 = dma.vmem_to_hbm [thread:$0]  %s409_s1, 1024, %s411_s26, [#allocation5], %s702_s20, %s702_s20, %s703_s21  }
  0xcf   :  { %v355_v1 = vadd.f32 %v354_v63, %v340_v61  ;;  %v319_v2 = vadd.f32 %v318_v62, %v242_v24 }
  0xd1   :  { %v320_v3 = vadd.f32 %v319_v2, %v245_v36  ;;  %v356_v5 = vadd.f32 %v355_v1, %v341_v0 }
  0xd3   :  { %v357_v6 = vadd.f32 %v356_v5, %v342_v4  ;;  %v321_v7 = vadd.f32 %v320_v3, %v247_v54 }
  0xd5   :  { %v322_v10 = vadd.f32 %v321_v7, %v739_v19  ;;  %v358_v11 = vadd.f32 %v357_v6, %v343_v8 }
  0xd7   :  { %v359_v13 = vadd.f32 %v358_v11, %v344_v9  ;;  %v323_v14 = vadd.f32 %v322_v10, %v741_v25 }
  0xd9   :  { %v324_v15 = vadd.f32 %v323_v14, %v255_v37  ;;  %v360_v17 = vadd.f32 %v359_v13, %v345_v12 }
  0xdb   :  { %v361_v18 = vadd.f32 %v360_v17, %v346_v16  ;;  %v325_v20 = vadd.f32 %v324_v15, %v257_v55 }
  0xdd   :  { %v326_v22 = vrot.slane %v325_v20, 4  ;;  %v362_v23 = vadd.f32 %v361_v18, %v347_v21 }
  0xdf   :  { %v327_v24 = vadd.f32 %v326_v22, %v325_v20  ;;  %v363_v26 = vrot.slane %v362_v23, 4 }
  0xe1   :  { %v328_v27 = vrot.slane %v327_v24, 2  ;;  %v364_v28 = vadd.f32 %v363_v26, %v362_v23 }
  0xe3   :  { %v329_v19 = vadd.f32 %v328_v27, %v327_v24  ;;  %v365_v29 = vrot.slane %v364_v28, 2 }
  0xe5   :  { %v330_v30 = vrot.slane %v329_v19, 1  ;;  %v366_v31 = vadd.f32 %v365_v29, %v364_v28 }
  0xe7   :  { %v367_v32 = vrot.slane %v366_v31, 1  ;;  %v331_v25 = vadd.f32 %v330_v30, %v329_v19 }
  0xe9   :  { %v368_v33 = vadd.f32 %v367_v32, %v366_v31 }
  0xeb   :  { %v370_v34 = vsel %vm369_vm0, %v331_v25, %v368_v33 }
  0xec   :  { %371 = vst [vmem:[#allocation9] sm:$0x3] %v370_v34 }
  0xed   :  { %427 = dma.vmem_to_hbm [thread:$0]  %s423_s27, 32, %s425_s30, [#allocation10]  }
  0xee   :  { %697 = dma.done.wait [#allocation5], 1024  }
  0xef   :  { %698 = vsyncadd [#allocation5], 4294966272 }
  0xf0   :  { %699 = dma.done.wait [#allocation10], 32  }
  0xf1   :  { %700 = vsyncadd [#allocation10], 4294967264 }
  0xf2   :  { %436 = vsyncpa [#allocation4], 1 }
  0xf3   :  { %437 = vsyncpa [#allocation7], 1 }
  0xf4   :  { %438 = vsyncpa [#allocation5], 1 }
  0xf5   :  { %439 = vsyncpa [#allocation10], 1 }

</bundles_post_ra>
